<compile_context>
chip_gen: v5e
topology: v5e:2x2
jax: 0.10.0
libtpu: 0.0.40
codegen_flags: <defaults>
</compile_context>

<pallas_src>
import math
import functools

import jax
import jax.numpy as jnp
from jax.experimental import pallas as pl
from jax.experimental.pallas import tpu as pltpu


LN_EPS = 1e-5                    # torch.nn.LayerNorm default
INV_SQRT2 = 1.0 / math.sqrt(2.0)


def _mlp_kernel(x_ref, gamma_ref, beta_ref, w1_ref, b1_ref, w2_ref, b2_ref, o_ref):
    """Fused LayerNorm -> fc1 -> GELU -> fc2 for one tile of tokens.

    x_ref:      (TM, C)  tile of tokens (f32)
    gamma/beta: (1, C)   LayerNorm affine params (f32, VMEM-resident)
    w1:         (C, H)   fc1 weight, [in, out] layout, bf16, VMEM-resident
    b1:         (1, H)   f32
    w2:         (H, O)   fc2 weight, [in, out] layout, bf16, VMEM-resident
    b2:         (1, O)   f32
    o_ref:      (TM, O)
    """
    x = x_ref[...].astype(jnp.float32)

    # LayerNorm over last dim (biased variance, torch semantics) -- f32 VPU math.
    mu = jnp.mean(x, axis=-1, keepdims=True)
    xc = x - mu
    var = jnp.mean(xc * xc, axis=-1, keepdims=True)
    xn = xc * jax.lax.rsqrt(var + LN_EPS)
    xn = xn * gamma_ref[...] + beta_ref[...]

    # fc1: bf16 MXU matmul with f32 accumulation, f32 bias add.
    h = jnp.dot(xn.astype(jnp.bfloat16), w1_ref[...],
                preferred_element_type=jnp.float32) + b1_ref[...]

    # Exact (erf) GELU, matching nn.GELU default.
    # TODO(synk): switch to the tanh approximation if erf's VPU polynomial becomes
    # the binding slot and the ~1e-3 delta is acceptable.
    h = 0.5 * h * (1.0 + jax.lax.erf(h * INV_SQRT2))

    # Dropout(p=0.0) is identity -> skipped.

    # fc2: bf16 MXU matmul with f32 accumulation, f32 bias add.
    y = jnp.dot(h.astype(jnp.bfloat16), w2_ref[...],
                preferred_element_type=jnp.float32) + b2_ref[...]

    o_ref[...] = y.astype(o_ref.dtype)


def _choose_tile_m(M, target=512):
    """Token-tile size: big enough to fill the MXU, >=2 grid steps when possible."""
    if M <= 2 * target:
        half = -(-M // 2)                    # ceil(M / 2)
        tile = max(8, -(-half // 8) * 8)     # round up to sublane multiple of 8
    else:
        tile = target
    return tile


@functools.partial(jax.jit, static_argnames=("tile_m",))
def mlp_forward(x, gamma, beta, w1, b1, w2, b2, *, tile_m=None):
    """x: [B, N, C] float32. Returns [B, N, out_features] float32."""
    B, N, C = x.shape
    H = w1.shape[1]
    O = w2.shape[1]

    # The module's LayerNorm is sized `hidden_features or in_features` but applied
    # to the input; it is only well-defined when that equals in_features.
    assert gamma.shape[-1] == C and beta.shape[-1] == C, (
        "LayerNorm dim must equal in_features (hidden_features==in_features)")
    assert w1.shape[0] == C and w2.shape[0] == H and b1.shape[-1] == H and b2.shape[-1] == O

    M = B * N
    x2d = x.reshape(M, C)

    if tile_m is None:
        tile_m = _choose_tile_m(M)
    assert tile_m % 8 == 0

    grid = (pl.cdiv(M, tile_m),)

    # Advisory cost hint for XLA scheduling around the kernel.
    cost = pl.CostEstimate(
        flops=2 * M * C * H + 2 * M * H * O + 10 * M * (C + H),
        transcendentals=M * H,
        bytes_accessed=M * C * 4 + M * O * 4 + (C * H + H * O) * 2 + (2 * C + H + O) * 4,
    )

    resident = pl.BlockSpec(memory_space=pltpu.MemorySpace.VMEM)  # single VMEM copy

    out = pl.pallas_call(
        _mlp_kernel,
        out_shape=jax.ShapeDtypeStruct((M, O), x.dtype),
        grid=grid,
        in_specs=[
            pl.BlockSpec((tile_m, C), lambda i: (i, 0)),   # x tile (pipelined)
            resident,                                      # gamma (1, C)
            resident,                                      # beta  (1, C)
            resident,                                      # w1    (C, H) bf16
            resident,                                      # b1    (1, H)
            resident,                                      # w2    (H, O) bf16
            resident,                                      # b2    (1, O)
        ],
        out_specs=pl.BlockSpec((tile_m, O), lambda i: (i, 0)),
        compiler_params=pltpu.CompilerParams(
            dimension_semantics=("parallel",),
            vmem_limit_bytes=32 * 1024 * 1024,
        ),
        cost_estimate=cost,
    )(x2d, gamma, beta, w1, b1, w2, b2)

    return out.reshape(B, N, O)


def xavier_uniform(key, fan_out, fan_in, dtype=jnp.float32):
    """torch.nn.init.xavier_uniform_ on a [fan_out, fan_in] Linear weight."""
    limit = math.sqrt(6.0 / (fan_in + fan_out))
    return jax.random.uniform(key, (fan_out, fan_in), dtype, minval=-limit, maxval=limit)


def init_mlp_params(key, in_features, hidden_features=None, out_features=None):
    out_features = out_features or in_features
    hidden_features = hidden_features or in_features

    k1, k2, k3, k4 = jax.random.split(key, 4)

    # LayerNorm (torch default init): weight=1, bias=0
    gamma = jnp.ones((1, hidden_features), jnp.float32)   # == in_features here
    beta = jnp.zeros((1, hidden_features), jnp.float32)

    # fc1 / fc2: xavier_uniform_ weights, normal(std=1e-6) biases
    w1_t = xavier_uniform(k1, hidden_features, in_features)          # [H, C] torch layout
    b1 = (1e-6 * jax.random.normal(k2, (hidden_features,))).astype(jnp.float32)
    w2_t = xavier_uniform(k3, out_features, hidden_features)         # [O, H] torch layout
    b2 = (1e-6 * jax.random.normal(k4, (out_features,))).astype(jnp.float32)

    # transpose to [in, out] and store matmul weights as bf16 (MXU inputs, half DMA)
    params = dict(
        gamma=gamma,
        beta=beta,
        w1=w1_t.T.astype(jnp.bfloat16),                  # [C, H]
        b1=b1.reshape(1, hidden_features),
        w2=w2_t.T.astype(jnp.bfloat16),                  # [H, O]
        b2=b2.reshape(1, out_features),
    )
    return params


def mlp_reference(x, p):
    """Pure-JAX f32 reference of the same forward pass (for a correctness check)."""
    mu = jnp.mean(x, axis=-1, keepdims=True)
    var = jnp.mean((x - mu) ** 2, axis=-1, keepdims=True)
    xn = (x - mu) / jnp.sqrt(var + LN_EPS)
    xn = xn * p["gamma"][0] + p["beta"][0]
    h = xn @ p["w1"].astype(jnp.float32) + p["b1"][0]
    h = 0.5 * h * (1.0 + jax.lax.erf(h * INV_SQRT2))
    return h @ p["w2"].astype(jnp.float32) + p["b2"][0]


if __name__ == "__main__":
    # Small, tile-friendly shapes: batch=2, tokens=8, features=128
    # (hidden_features defaults to in_features, matching the module's norm dim).
    B, N, C = 2, 8, 128
    in_features = C
    hidden_features = None   # -> C
    out_features = None      # -> C

    key = jax.random.PRNGKey(0)
    k_param, k_x = jax.random.split(key)

    params = init_mlp_params(k_param, in_features, hidden_features, out_features)
    x = jax.random.normal(k_x, (B, N, C), jnp.float32)

    y = mlp_forward(
        x,
        params["gamma"], params["beta"],
        params["w1"], params["b1"],
        params["w2"], params["b2"],
    )
    y = jax.block_until_ready(y)

    # sanity check against pure-JAX f32 reference (bf16 MXU inputs -> looser tol)
    y_ref = mlp_reference(x, params)
    assert y.shape == (B, N, C)
    max_err = float(jnp.max(jnp.abs(y - y_ref)))
    assert max_err < 5e-2, f"mismatch vs reference: {max_err}"

    print("KERNEL_OK")
</pallas_src>

<mosaic_0001>
module attributes {stable_mosaic.version = 11 : i64} {
  func.func @_mlp_kernel(%arg0: i32, %arg1: memref<8x128xf32, #tpu.memory_space<vmem>>, %arg2: memref<1x128xf32, #tpu.memory_space<vmem>>, %arg3: memref<1x128xf32, #tpu.memory_space<vmem>>, %arg4: memref<128x128xbf16, #tpu.memory_space<vmem>>, %arg5: memref<1x128xf32, #tpu.memory_space<vmem>>, %arg6: memref<128x128xbf16, #tpu.memory_space<vmem>>, %arg7: memref<1x128xf32, #tpu.memory_space<vmem>>, %arg8: memref<8x128xf32, #tpu.memory_space<vmem>>) attributes {dimension_semantics = [#tpu.dimension_semantics<parallel>], iteration_bounds = array<i64: 2>, scalar_prefetch = 0 : i64, scratch_operands = 0 : i64, tpu.core_type = #tpu.core_type<tc>, window_params = [{transform_indices = @transform_0, window_bounds = array<i64: 8, 128>}, {pipeline_mode = #tpu.pipeline_mode<synchronous>, transform_indices = @transform_1, window_bounds = array<i64: 1, 128>}, {pipeline_mode = #tpu.pipeline_mode<synchronous>, transform_indices = @transform_2, window_bounds = array<i64: 1, 128>}, {pipeline_mode = #tpu.pipeline_mode<synchronous>, transform_indices = @transform_3, window_bounds = array<i64: 128, 128>}, {pipeline_mode = #tpu.pipeline_mode<synchronous>, transform_indices = @transform_4, window_bounds = array<i64: 1, 128>}, {pipeline_mode = #tpu.pipeline_mode<synchronous>, transform_indices = @transform_5, window_bounds = array<i64: 128, 128>}, {pipeline_mode = #tpu.pipeline_mode<synchronous>, transform_indices = @transform_6, window_bounds = array<i64: 1, 128>}, {transform_indices = @transform_7, window_bounds = array<i64: 8, 128>}]} {
    %c0 = arith.constant 0 : index
    %c0_0 = arith.constant 0 : index
    %0 = vector.load %arg1[%c0, %c0_0] : memref<8x128xf32, #tpu.memory_space<vmem>>, vector<8x128xf32>
    %cst = arith.constant dense<0.000000e+00> : vector<8xf32>
    %1 = vector.multi_reduction <add>, %0, %cst [1] : vector<8x128xf32> to vector<8xf32>
    %2 = vector.shape_cast %1 : vector<8xf32> to vector<8x1xf32>
    %cst_1 = arith.constant 1.280000e+02 : f32
    %3 = vector.broadcast %cst_1 : f32 to vector<8x1xf32>
    %4 = arith.divf %2, %3 : vector<8x1xf32>
    %5 = vector.broadcast %4 : vector<8x1xf32> to vector<8x128xf32>
    %6 = arith.subf %0, %5 : vector<8x128xf32>
    %7 = arith.mulf %6, %6 : vector<8x128xf32>
    %cst_2 = arith.constant dense<0.000000e+00> : vector<8xf32>
    %8 = vector.multi_reduction <add>, %7, %cst_2 [1] : vector<8x128xf32> to vector<8xf32>
    %9 = vector.shape_cast %8 : vector<8xf32> to vector<8x1xf32>
    %cst_3 = arith.constant 1.280000e+02 : f32
    %10 = vector.broadcast %cst_3 : f32 to vector<8x1xf32>
    %11 = arith.divf %9, %10 : vector<8x1xf32>
    %cst_4 = arith.constant 9.99999974E-6 : f32
    %12 = vector.broadcast %cst_4 : f32 to vector<8x1xf32>
    %13 = arith.addf %11, %12 : vector<8x1xf32>
    %14 = math.rsqrt %13 : vector<8x1xf32>
    %15 = vector.broadcast %14 : vector<8x1xf32> to vector<8x128xf32>
    %16 = arith.mulf %6, %15 : vector<8x128xf32>
    %c0_5 = arith.constant 0 : index
    %c0_6 = arith.constant 0 : index
    %17 = vector.load %arg2[%c0_5, %c0_6] : memref<1x128xf32, #tpu.memory_space<vmem>>, vector<1x128xf32>
    %18 = vector.broadcast %17 : vector<1x128xf32> to vector<8x128xf32>
    %19 = arith.mulf %16, %18 : vector<8x128xf32>
    %c0_7 = arith.constant 0 : index
    %c0_8 = arith.constant 0 : index
    %20 = vector.load %arg3[%c0_7, %c0_8] : memref<1x128xf32, #tpu.memory_space<vmem>>, vector<1x128xf32>
    %21 = vector.broadcast %20 : vector<1x128xf32> to vector<8x128xf32>
    %22 = arith.addf %19, %21 : vector<8x128xf32>
    %23 = arith.truncf %22 : vector<8x128xf32> to vector<8x128xbf16>
    %c0_9 = arith.constant 0 : index
    %c0_10 = arith.constant 0 : index
    %24 = vector.load %arg4[%c0_9, %c0_10] : memref<128x128xbf16, #tpu.memory_space<vmem>>, vector<128x128xbf16>
    %cst_11 = arith.constant dense<0.000000e+00> : vector<8x128xf32>
    %25 = tpu.matmul %23, %24, %cst_11 {dimension_numbers = #tpu.dot_dimension_numbers<[1], [0], [0], [1], [0, 0, 1, 1], [], []>} : vector<8x128xbf16>, vector<128x128xbf16>, vector<8x128xf32> -> vector<8x128xf32>
    %c0_12 = arith.constant 0 : index
    %c0_13 = arith.constant 0 : index
    %26 = vector.load %arg5[%c0_12, %c0_13] : memref<1x128xf32, #tpu.memory_space<vmem>>, vector<1x128xf32>
    %27 = vector.broadcast %26 : vector<1x128xf32> to vector<8x128xf32>
    %28 = arith.addf %25, %27 : vector<8x128xf32>
    %cst_14 = arith.constant 5.000000e-01 : f32
    %29 = vector.broadcast %cst_14 : f32 to vector<8x128xf32>
    %30 = arith.mulf %29, %28 : vector<8x128xf32>
    %cst_15 = arith.constant 0.707106769 : f32
    %31 = vector.broadcast %cst_15 : f32 to vector<8x128xf32>
    %32 = arith.mulf %28, %31 : vector<8x128xf32>
    %33 = math.erf %32 : vector<8x128xf32>
    %cst_16 = arith.constant 1.000000e+00 : f32
    %34 = vector.broadcast %cst_16 : f32 to vector<8x128xf32>
    %35 = arith.addf %34, %33 : vector<8x128xf32>
    %36 = arith.mulf %30, %35 : vector<8x128xf32>
    %37 = arith.truncf %36 : vector<8x128xf32> to vector<8x128xbf16>
    %c0_17 = arith.constant 0 : index
    %c0_18 = arith.constant 0 : index
    %38 = vector.load %arg6[%c0_17, %c0_18] : memref<128x128xbf16, #tpu.memory_space<vmem>>, vector<128x128xbf16>
    %cst_19 = arith.constant dense<0.000000e+00> : vector<8x128xf32>
    %39 = tpu.matmul %37, %38, %cst_19 {dimension_numbers = #tpu.dot_dimension_numbers<[1], [0], [0], [1], [0, 0, 1, 1], [], []>} : vector<8x128xbf16>, vector<128x128xbf16>, vector<8x128xf32> -> vector<8x128xf32>
    %c0_20 = arith.constant 0 : index
    %c0_21 = arith.constant 0 : index
    %40 = vector.load %arg7[%c0_20, %c0_21] : memref<1x128xf32, #tpu.memory_space<vmem>>, vector<1x128xf32>
    %41 = vector.broadcast %40 : vector<1x128xf32> to vector<8x128xf32>
    %42 = arith.addf %39, %41 : vector<8x128xf32>
    %c0_22 = arith.constant 0 : index
    %c0_23 = arith.constant 0 : index
    %43 = vector.load %arg8[%c0_22, %c0_23] : memref<8x128xf32, #tpu.memory_space<vmem>>, vector<8x128xf32>
    tpu.vector_store %arg8[%c0_22, %c0_23], %42 {strides = array<i32>} : memref<8x128xf32, #tpu.memory_space<vmem>>, vector<8x128xf32>,
    return
  }
  func.func @transform_0(%arg0: i32) -> (i32, i32) {
    %c0_i32 = arith.constant 0 : i32
    %c0_i32_0 = arith.constant 0 : i32
    return %arg0, %c0_i32 : i32, i32
  }
  func.func @transform_1(%arg0: i32) -> (i32, i32) {
    %c0_i32 = arith.constant 0 : i32
    %c0_i32_0 = arith.constant 0 : i32
    %c0_i32_1 = arith.constant 0 : i32
    return %c0_i32, %c0_i32_0 : i32, i32
  }
  func.func @transform_2(%arg0: i32) -> (i32, i32) {
    %c0_i32 = arith.constant 0 : i32
    %c0_i32_0 = arith.constant 0 : i32
    %c0_i32_1 = arith.constant 0 : i32
    return %c0_i32, %c0_i32_0 : i32, i32
  }
  func.func @transform_3(%arg0: i32) -> (i32, i32) {
    %c0_i32 = arith.constant 0 : i32
    %c0_i32_0 = arith.constant 0 : i32
    %c0_i32_1 = arith.constant 0 : i32
    return %c0_i32, %c0_i32_0 : i32, i32
  }
  func.func @transform_4(%arg0: i32) -> (i32, i32) {
    %c0_i32 = arith.constant 0 : i32
    %c0_i32_0 = arith.constant 0 : i32
    %c0_i32_1 = arith.constant 0 : i32
    return %c0_i32, %c0_i32_0 : i32, i32
  }
  func.func @transform_5(%arg0: i32) -> (i32, i32) {
    %c0_i32 = arith.constant 0 : i32
    %c0_i32_0 = arith.constant 0 : i32
    %c0_i32_1 = arith.constant 0 : i32
    return %c0_i32, %c0_i32_0 : i32, i32
  }
  func.func @transform_6(%arg0: i32) -> (i32, i32) {
    %c0_i32 = arith.constant 0 : i32
    %c0_i32_0 = arith.constant 0 : i32
    %c0_i32_1 = arith.constant 0 : i32
    return %c0_i32, %c0_i32_0 : i32, i32
  }
  func.func @transform_7(%arg0: i32) -> (i32, i32) {
    %c0_i32 = arith.constant 0 : i32
    %c0_i32_0 = arith.constant 0 : i32
    return %arg0, %c0_i32 : i32, i32
  }
}

</mosaic_0001>

<bundles_post_ra>
// kernel: mlp_forward.1
= control target key start
LH: loop header
LB: loop body
LE: loop exit
PB: predicated region body
PF: predicated region fallthrough
CT: control target
= control target key end

     0   :  { %s1226_s0 = inlined_call_operand.hbm [shape: f32[16,128], index: 0, kind: input, shape index: {}]   ;;  %s1227_s1 = inlined_call_operand.vmem [shape: f32[1,128], index: 1, kind: input, shape index: {}]   ;;  %s1228_s2 = inlined_call_operand.vmem [shape: f32[1,128], index: 2, kind: input, shape index: {}]   ;;  %s1229_s3 = inlined_call_operand.hbm [shape: bf16[128,128], index: 3, kind: input, shape index: {}]   ;;  %s1230_s4 = inlined_call_operand.vmem [shape: f32[1,128], index: 4, kind: input, shape index: {}]   ;;  %s1231_s5 = inlined_call_operand.hbm [shape: bf16[128,128], index: 5, kind: input, shape index: {}]   ;;  %s1232_s6 = inlined_call_operand.vmem [shape: f32[1,128], index: 6, kind: input, shape index: {}]   ;;  %s1233_s7 = inlined_call_operand.hbm [shape: f32[16,128], index: 7, kind: output, shape index: {}]  }
   0x1   :  { %1234 = sst [smem:[#allocation12_spill]] %s1229_s3 }
   0x2   :  { %1235 = sst [smem:[#allocation13_spill]] %s1231_s5 }
   0x3   :  { %12 = vsyncpa [#allocation3], 0 }
   0x4   :  { %14 = vsyncpa [#allocation3 + $0x1], 0 }
   0x5   :  { %15 = vsyncpa [#allocation6], 0 }
   0x6   :  { %16 = vsyncpa [#allocation4], 0 }
   0x7   :  { %18 = vsyncpa [#allocation4 + $0x1], 0  ;;  %s1065_s24 = smov 0   ;;  %s1067_s25 = smov 0  }
   0x8   :  { %s1069_s26 = smov 0   ;;  %s1071_s27 = smov 0  }
   0x9 LB: > { %s1236_s3 = sld [smem:[#allocation12_spill]]  ;;  %s1089_s8 = sadd.s32 4294967295, %s1018_s27   ;;  %s1018_s27 = sphi %s1071_s27, %s1248_s27   ;;  %s1014_s26 = sphi %s1069_s26, %s1247_s26   ;;  %s1010_s25 = sphi %s1067_s25, %s1246_s25   ;;  %s1006_s24 = sphi %s1065_s24, %s1245_s24  }
   0xa   : > { %p682_p0 = scmp.ge.s32.totalorder %s1018_s27, 1  ;;  %p45_p1 = scmp.eq.s32.totalorder %s1089_s8, 0 }
   0xb   : > { %p207_p2 = scmp.lt.s32.totalorder %s1018_s27, 3  ;;  %s1020_s10 = smov [#allocation5]  }
   0xc   : > { %s226_s11 = sshll.u32 %s1020_s10, 4  ;;  %s1238_s5 = sld [smem:[#allocation13_spill]]  ;;  %s227_s11 = int_to_ptr.vmem [resolvable:$true] %s226_s11 }
   0xd   : > { %p1094_p3 = pnand %p682_p0, %p207_p2  ;;  %s1021_s15 = smov [#allocation7]  }
   0xe   : > { %s243_s16 = sshll.u32 %s1021_s15, 4  ;;  %s1022_s17 = smov 64   ;;  %s244_s16 = int_to_ptr.vmem [resolvable:$true] %s243_s16 }
   0xf   : > { %s224_s30 = sshll.u32 %s1236_s3, 4  ;;  %p790_p4 = pneg %p1094_p3  ;;  %s225_s30 = int_to_ptr.hbm [resolvable:$true] %s224_s30 }
  0x10   : > { %s1023_s18 = smov 4   ;;  %s681_s19 = sadd.s32 4294967294, %s1018_s27  }
  0x11   : > { %p791_p6 = pnand %p790_p4, %p45_p1  ;;  %s1108_s20 = sadd.s32 1, %s1018_s27  }
  0x12   : > { %s241_s14 = sshll.u32 %s1238_s5, 4  ;;  %s28_s21 = ssub.s32 %s1018_s27, %s1108_s20  ;;  %s242_s14 = int_to_ptr.hbm [resolvable:$true] %s241_s14 }
  0x13   : > { %793 = dma.hbm_to_vmem [thread:$0]  (!%p791_p6), %s225_s30, 1024, %s227_s11, [#allocation6], %s1022_s17, %s1022_s17, %s1023_s18  }
  0x14   : > { %796 = dma.hbm_to_vmem [thread:$0]  (!%p791_p6), %s242_s14, 1024, %s244_s16, [#allocation6], %s1022_s17, %s1022_s17, %s1023_s18  }
  0x15   : > { %s31_s22 = sadd.s32 1, %s1014_s26  ;;  %p29_p7 = scmp.eq.s32.totalorder %s28_s21, 0 }
  0x16   : > { %p38_p8 = scmp.ne.s32.totalorder %s1014_s26, %s1010_s25  ;;  %p39_p9 = scmp.eq.s32.totalorder %s1018_s27, 0 }
  0x17   : > { %p44_p10 = scmp.ne.s32.totalorder %s1010_s25, %s1006_s24  ;;  %p194_p13 = scmp.eq.s32.totalorder %s1089_s8, 1 }
  0x18   : > { %s1119_s23 = scalar_select %p29_p7, %s1014_s26, %s31_s22  }
  0x19   : > { %p1121_p11 = por %p39_p9, %p38_p8  ;;  %p1127_p12 = por %p45_p1, %p44_p10 }
  0x1a   : > { %p200_p0 = scmp.eq.s32.totalorder %s681_s19, 1  ;;  %p807_p2 = scmp.lt.s32.totalorder %s1018_s27, 2 }
  0x1b   : > { %s260_s30 = sand.u32 1, %s1014_s26   ;;  %p1134_p4 = por %p194_p13, %p38_p8 }
  0x1c   : > { %p1138_p6 = por %p200_p0, %p44_p10  ;;  %s686_s12 = sshll.u32 %s260_s30, 3 }
  0x1d   : > { %s687_s13 = sshll.u32 %s1018_s27, 3  ;;  %s264_s17 = scalar_lea.vmem [#allocation2], %s686_s12 }
  0x1e   : > { %s268_s16 = scalar_lea.hbm %s1226_s0, %s687_s13  ;;  %s272_s18 = sshll.u32 %s264_s17, 4  ;;  %s273_s18 = int_to_ptr.vmem [resolvable:$true] %s272_s18 }
  0x1f   : > { %s270_s21 = sshll.u32 %s268_s16, 4  ;;  %p1148_p7 = pnand %p807_p2, %p1121_p11  ;;  %s271_s21 = int_to_ptr.hbm [resolvable:$true] %s270_s21 }
  0x20   : > { %s261_s22 = scalar_lea.sflag [#allocation3], %s260_s30  ;;  %s918_s3 = sshra.s32 %s271_s21, 4  ;;  %s919_s3 = int_to_ptr.hbm [resolvable:$true] %s918_s3 }
  0x21   : > { %s920_s5 = scalar_lea.hbm %s919_s3, 8  ;;  %p922_p9 = pneg %p1148_p7 }
  0x22   : > { %p921_p8 = scmp.ne.s32.totalorder %s919_s3, %s920_s5  ;;  %s925_s14 = scalar_lea.hbm %s1226_s0, 16 }
  0x23   : > { %p926_p11 = scmp.lt.s32.totalorder %s919_s3, %s1226_s0  ;;  %p927_p0 = scmp.lt.s32.totalorder %s925_s14, %s920_s5 }
  0x24   : > { %p923_p10 = pnand %p922_p9, %p921_p8 }
  0x25   : > { %p928_p2 = por %p927_p0, %p926_p11 }
  0x26   : > { %p924_p13 = pneg %p923_p10 }
  0x28   : > { %p929_p5 = pnand %p928_p2, %p924_p13 }
  0x2a   : > { %932 = shalt.err (!%p929_p5)
}
  0x2b   : > { %800 = dma.hbm_to_vmem [thread:$0]  (!%p1148_p7), %s271_s21, 128, %s273_s18, %s261_s22  }
  0x2c   : > { %281 = sbr.rel (%p1094_p3) target bundleno = 636 (0x27c), region = 48  ;;  %s1165_s30 = sand.u32 (!%p1094_p3), 1, %s1010_s25  }
  0x2d   : > { %s689_s16 = sshll.u32 (!%p1094_p3), %s1165_s30, 3  ;;  %s284_s17 = scalar_lea.sflag (!%p1094_p3), [#allocation3], %s1165_s30 }
  0x2e   : > { %s287_s3 = scalar_lea.vmem (!%p1094_p3), [#allocation2], %s689_s16 }
  0x31   : > { %993 = dma.done.wait (%p1127_p12), %s284_s17, 128  }
  0x32   : > { %995 = vsyncadd (%p1127_p12), %s284_s17, 4294967168 }
  0x33   : > { %997 = dma.done.wait (%p45_p1), [#allocation6], 2048  }
  0x34   : > { %999 = vsyncadd (%p45_p1), [#allocation6], 4294965248  ;;  %v329_v0 = vld [vmem:[%s287_s3] sm:$0xff]  ;;  %v1024_v1 = vmov 128.0   ;;  %v767_v14 = vld [vmem:[#allocation5 + $0x28] sm:$0xff]  ;;  %s759_s22 = sshll.u32 %s1089_s8, 3 }
  0x35   : > { %330 = vadd.xlane.f32.xlu0 %v329_v0  ;;  %852 = vrcp.f32 %v1024_v1  ;;  %v769_v2 = vld [vmem:[#allocation5 + $0x38] sm:$0xff]  ;;  %v768_v13 = vld [vmem:[#allocation5 + $0x30] sm:$0xff]  ;;  %v766_v15 = vld [vmem:[#allocation5 + $0x20] sm:$0xff]  ;;  %s587_s14 = scalar_lea.hbm %s1233_s7, %s759_s22  ;;  %s328_s17 = scalar_lea.vmem [#allocation8], %s689_s16 }
  0x36   : > { %436 = vmatpush.bf16.msra.mxu0 %v769_v2  ;;  %v765_v16 = vld [vmem:[#allocation5 + $0x18] sm:$0xff]  ;;  %v764_v17 = vld [vmem:[#allocation5 + $0x10] sm:$0xff]  ;;  %v763_v18 = vld [vmem:[#allocation5 + $0x8] sm:$0xff]  ;;  %s589_s3 = sshll.u32 %s328_s17, 4  ;;  %s591_s5 = sshll.u32 %s587_s14, 4  ;;  %s590_s3 = int_to_ptr.vmem [resolvable:$true] %s589_s3  ;;  %s592_s5 = int_to_ptr.hbm [resolvable:$true] %s591_s5 }
  0x37   : > { %v762_v19 = vld [vmem:[#allocation5] sm:$0xff]  ;;  %v848_v29 = vld [vmem:[%s1227_s1] ss:$0 sm:$0xff]  ;;  %v777_v36 = vld [vmem:[#allocation7 + $0x38] sm:$0xff]  ;;  %s577_s9 = scalar_lea.sflag [#allocation4], %s1165_s30  ;;  %s962_s8 = sshra.s32 %s592_s5, 4  ;;  %s963_s8 = int_to_ptr.hbm [resolvable:$true] %s962_s8 }
  0x38   : > { %v849_v32 = vld [vmem:[%s1228_s2] ss:$0 sm:$0xff]  ;;  %562 = vmatpush.bf16.msra.mxu1 %v777_v36  ;;  %v775_v39 = vld [vmem:[#allocation7 + $0x28] sm:$0xff]  ;;  %v774_v42 = vld [vmem:[#allocation7 + $0x20] sm:$0xff]  ;;  %s964_s29 = scalar_lea.hbm %s963_s8, 8  ;;  %s968_s19 = scalar_lea.hbm %s1233_s7, 16 }
  0x39   : > { %v776_v37 = vld [vmem:[#allocation7 + $0x30] sm:$0xff]  ;;  %v773_v45 = vld [vmem:[#allocation7 + $0x18] sm:$0xff]  ;;  %v771_v54 = vld [vmem:[#allocation7 + $0x8] sm:$0xff]  ;;  %p965_p1 = scmp.ne.s32.totalorder %s963_s8, %s964_s29  ;;  %p969_p12 = scmp.lt.s32.totalorder %s963_s8, %s1233_s7 }
  0x3a   : > { %437 = vmatpush.bf16.msra.mxu0 %v768_v13  ;;  %v850_v38 = vld [vmem:[%s1230_s4] ss:$0 sm:$0xff]  ;;  %v770_v58 = vld [vmem:[#allocation7] sm:$0xff]  ;;  %p970_p7 = scmp.lt.s32.totalorder %s968_s19, %s964_s29 }
  0x3b   : > { %v853_v3 = vpop.eup %852  ;;  %v772_v49 = vld [vmem:[#allocation7 + $0x10] sm:$0xff]  ;;  %p966_p3 = pnand %p965_p1, %p1134_p4 }
  0x3c   : > { %v333_v4 = vmul.f32 128.0, %v853_v3  ;;  %vm337_vm0 = vweird.f32 %v853_v3  ;;  %563 = vmatpush.bf16.msra.mxu1 %v776_v37  ;;  %p971_p8 = por %p970_p7, %p969_p12 }
  0x3d   : > { %p967_p5 = pneg %p966_p3 }
  0x3e   : > { %v334_v5 = vsub.f32 1.0, %v333_v4  ;;  %438 = vmatpush.bf16.msra.mxu0 %v767_v14 }
  0x3f   : > { %p972_p9 = pnand %p971_p8, %p967_p5 }
  0x40   : > { %v335_v6 = vmul.f32 %v853_v3, %v334_v5  ;;  %564 = vmatpush.bf16.msra.mxu1 %v775_v39 }
  0x42   : > { %v336_v7 = vadd.f32 %v853_v3, %v335_v6  ;;  %439 = vmatpush.bf16.msra.mxu0 %v766_v15 }
  0x44   : > { %v338_v8 = vsel %vm337_vm0, %v853_v3, %v336_v7  ;;  %565 = vmatpush.bf16.msra.mxu1 %v774_v42 }
  0x46   : > { %440 = vmatpush.bf16.msra.mxu0 %v765_v16 }
  0x48   : > { %566 = vmatpush.bf16.msra.mxu1 %v773_v45 }
  0x4a   : > { %441 = vmatpush.bf16.msra.mxu0 %v764_v17 }
  0x4c   : > { %567 = vmatpush.bf16.msra.mxu1 %v772_v49 }
  0x4e   : > { %442 = vmatpush.bf16.msra.mxu0 %v763_v18 }
  0x50   : > { %568 = vmatpush.bf16.msra.mxu1 %v771_v54 }
  0x52   : > { %443 = vmatpush.bf16.msra.mxu0 %v762_v19 }
  0x54   : > { %569 = vmatpush.bf16.msra.mxu1 %v770_v58 }
  0xa8   : > { %v331_v9 = vpop.xlane.xlu0 %330 }
  0xa9   : > { %v339_v10 = vmul.f32 %v338_v8, %v331_v9 }
  0xab   : > { %v340_v11 = vsub.f32 %v329_v0, %v339_v10 }
  0xad   : > { %v341_v12 = vmul.f32 %v340_v11, %v340_v11 }
  0xaf   : > { %342 = vadd.xlane.f32.xlu0 %v341_v12 }
 0x122   : > { %v343_v20 = vpop.xlane.xlu0 %342 }
 0x123   : > { %v344_v21 = vmul.f32 %v343_v20, %v338_v8 }
 0x125   : > { %v345_v22 = vadd.f32 1e-05, %v344_v21 }
 0x127   : > { %854 = vrsqrt.f32 %v345_v22  ;;  %vm352_vm2 = vweird.f32 %v345_v22 }
 0x12d   : > { %v855_v23 = vpop.eup %854 }
 0x12e   : > { %v347_v24 = vmul.f32 %v855_v23, %v345_v22  ;;  %vm353_vm1 = vweird.f32 %v855_v23 }
 0x12f   : > { %vm354_vm3 = vmor %vm352_vm2, %vm353_vm1 }
 0x130   : > { %v348_v25 = vmul.f32 %v855_v23, %v347_v24  ;;  %v851_v24 = vld [vmem:[%s1232_s6] ss:$0 sm:$0xff] }
 0x132   : > { %v349_v26 = vmul.f32 0.5, %v348_v25 }
 0x134   : > { %v350_v27 = vsub.f32 1.5, %v349_v26 }
 0x136   : > { %v351_v28 = vmul.f32 %v855_v23, %v350_v27 }
 0x138   : > { %v355_v30 = vsel %vm354_vm3, %v855_v23, %v351_v28 }
 0x139   : > { %v356_v31 = vmul.f32 %v355_v30, %v340_v11 }
 0x13b   : > { %v361_v33 = vmul.f32 %v848_v29, %v356_v31 }
 0x13d   : > { %v366_v34 = vadd.f32 %v849_v32, %v361_v33 }
 0x13f   : > { %v367_v35 = vpack.c.bf16 %v366_v34, %v366_v34 }
 0x141   : > { %444 = vmatmul.bf16.vlgmr.msra.gmra.mxu0 %v367_v35 }
 0x1be   : > { %v445_v40 = vpop.f32.mrf.mxu0 }
 0x1bf   : > { %v446_v41 = vadd.f32 %v850_v38, %v445_v40 }
 0x1c1   : > { %v450_v43 = vmul.f32 0.70710677, %v446_v41  ;;  %v449_v20 = vmul.f32 0.5, %v446_v41 }
 0x1c3   : > { %v451_v44 = vmul.f32 %v450_v43, %v450_v43 }
 0x1c5   : > { %v452_v46 = vmin.f32 %v451_v44, 16.0 }
 0x1c6   : > { %v447_v47 = vpop.f32.mrf.mxu0 }
 0x1c7   : > { %v453_v48 = vmul.f32 2.1237322e-06, %v452_v46  ;;  %v464_v50 = vmul.f32 3.8918573e-05, %v452_v46 }
 0x1c9   : > { %v454_v51 = vadd.f32 0.00028619796, %v453_v48  ;;  %v465_v52 = vadd.f32 0.001143296, %v464_v50 }
 0x1cb   : > { %v455_v53 = vmul.f32 %v454_v51, %v452_v46  ;;  %v466_v55 = vmul.f32 %v465_v52, %v452_v46 }
 0x1cd   : > { %v467_v56 = vadd.f32 0.014752088, %v466_v55  ;;  %v456_v57 = vadd.f32 0.0036580483, %v455_v53 }
 0x1cf   : > { %v468_v59 = vmul.f32 %v467_v56, %v452_v46  ;;  %v457_v61 = vmul.f32 %v456_v57, %v452_v46 }
 0x1d1   : > { %v469_v60 = vadd.f32 0.112945676, %v468_v59  ;;  %v458_v0 = vadd.f32 0.05243302, %v457_v61 }
 0x1d3   : > { %v470_v62 = vmul.f32 %v469_v60, %v452_v46  ;;  %v459_v3 = vmul.f32 %v458_v0, %v452_v46 }
 0x1d5   : > { %v471_v63 = vadd.f32 0.4994258, %v470_v62  ;;  %v460_v4 = vadd.f32 0.18741608, %v459_v3 }
 0x1d7   : > { %v472_v1 = vmul.f32 %v471_v63, %v452_v46  ;;  %v461_v6 = vmul.f32 %v460_v4, %v452_v46 }
 0x1d9   : > { %v473_v2 = vadd.f32 1.0, %v472_v1  ;;  %v462_v10 = vadd.f32 1.1283791, %v461_v6 }
 0x1db   : > { %856 = vrcp.f32 %v473_v2  ;;  %v485_v9 = vand.u32 2147483648, %v473_v2  ;;  %v483_v12 = vand.u32 2147483647, %v473_v2  ;;  %vm479_vm5 = vweird.f32 %v473_v2 }
 0x1dc   : > { %v463_v15 = vmul.f32 %v462_v10, %v450_v43 }
 0x1dd   : > { %v486_v14 = vor.u32 1.1754944e-38, %v485_v9  ;;  %vm484_vm7 = vcmp.eq.f32.partialorder %v483_v12, 8.507059e+37 }
 0x1e1   : > { %v857_v5 = vpop.eup %856 }
 0x1e2   : > { %v475_v7 = vmul.f32 %v857_v5, %v473_v2  ;;  %vm480_vm4 = vweird.f32 %v857_v5 }
 0x1e3   : > { %vm481_vm6 = vmor %vm479_vm5, %vm480_vm4 }
 0x1e4   : > { %v476_v8 = vsub.f32 1.0, %v475_v7 }
 0x1e6   : > { %v477_v11 = vmul.f32 %v857_v5, %v476_v8 }
 0x1e8   : > { %v478_v13 = vadd.f32 %v857_v5, %v477_v11 }
 0x1ea   : > { %v482_v16 = vsel %vm481_vm6, %v857_v5, %v478_v13 }
 0x1eb   : > { %v487_v17 = vsel %vm484_vm7, %v486_v14, %v482_v16 }
 0x1ec   : > { %v488_v18 = vmul.f32 %v487_v17, %v463_v15 }
 0x1ee   : > { %v725_v19 = vclamps-f32 %v488_v18, 1.0 }
 0x1f0   : > { %v491_v21 = vadd.f32 1.0, %v725_v19 }
 0x1f2   : > { %v492_v22 = vmul.f32 %v491_v21, %v449_v20 }
 0x1f4   : > { %v493_v23 = vpack.c.bf16 %v492_v22, %v492_v22 }
 0x1f6   : > { %570 = vmatmul.bf16.vlgmr.msra.gmra.mxu1 %v493_v23 }
 0x273   : > { %v571_v25 = vpop.f32.mrf.mxu1 }
 0x274   : > { %v572_v26 = vadd.f32 %v851_v24, %v571_v25 }
 0x276   : > { %575 = vst [vmem:[%s328_s17] sm:$0xff] %v572_v26 }
 0x277   : > { %975 = shalt.err (!%p972_p9)
}
 0x278   : > { %788 = dma.vmem_to_hbm [thread:$0]  (%p1134_p4), %s590_s3, 128, %s592_s5, %s577_s9  }
 0x27b   : > { %v573_v27 = vpop.f32.mrf.mxu1 }
 0x27c PF: > { %s603_s30 = sand.u32 1, %s1006_s24   ;;  %p1244_p10 = scmp.ge.s32.totalorder %s1018_s27, 2 }
 0x27d   : > { %s604_s12 = scalar_lea.sflag [#allocation4], %s603_s30 }
 0x27e   : > { %p802_p13 = pnand %p1244_p10, %p1138_p6 }
 0x280   : > { %p803_p11 = pneg %p802_p13 }
 0x282   : > { %1001 = dma.done.wait (%p803_p11), %s604_s12, 128  }
 0x283   : > { %1003 = vsyncadd (%p803_p11), %s604_s12, 4294967168  ;;  %p21_p0 = scmp.ge.s32.totalorder %s1108_s20, 4   ;;  %s1245_s24 = smov %s1010_s25 }
 0x284   : > { %s1246_s25 = smov %s1014_s26  ;;  %s1247_s26 = smov %s1119_s23 }
 0x285   : > { %s1248_s27 = smov %s1108_s20  ;;  %23 = sbr.rel (!%p21_p0) target bundleno = 9 (0x9), region = 101 }
 0x28a   :  { %610 = vsyncpa [#allocation3], 1 }
 0x28b   :  { %612 = vsyncpa [#allocation3 + $0x1], 1 }
 0x28c   :  { %613 = vsyncpa [#allocation6], 1 }
 0x28d   :  { %614 = vsyncpa [#allocation4], 1 }
 0x28e   :  { %616 = vsyncpa [#allocation4 + $0x1], 1 }

</bundles_post_ra>
